<compile_context>
chip_gen: v7x
topology: tpu7x:2x2x1
jax: 0.10.0
libtpu: 0.0.40
codegen_flags: <defaults>
</compile_context>

<pallas_src>
import functools

import jax
import jax.numpy as jnp
from jax.experimental import pallas as pl
from jax.experimental.pallas import tpu as pltpu


def _round_up(x, m):
    return ((x + m - 1) // m) * m


def _tpu_arch_info():
    """Per-generation knobs: MXU rows, per-core VMEM, #TensorCores, bf16 VPU."""
    kind = ""
    try:
        kind = jax.devices()[0].device_kind.lower()
    except Exception:
        pass
    if "v5 lite" in kind or "v5e" in kind or "v5lite" in kind:
        return {"mxu_rows": 128, "vmem": 128 << 20, "num_tc": 1, "bf16_act": False}
    if "v6" in kind:
        return {"mxu_rows": 256, "vmem": 128 << 20, "num_tc": 1, "bf16_act": True}
    if "v7" in kind:
        return {"mxu_rows": 256, "vmem": 64 << 20, "num_tc": 2, "bf16_act": True}
    # Unknown / older generation: conservative defaults (f32 VPU path).
    return {"mxu_rows": 128, "vmem": 64 << 20, "num_tc": 1, "bf16_act": False}


def pointnet_kernel(x_ref,
                    w1_ref, b1_ref, w2_ref, b2_ref, w3_ref, b3_ref,
                    wm1_ref, bm1_ref, wm2_ref, bm2_ref, wm3_ref, bm3_ref,
                    out_ref, feat_ref, *, p_chunk, act_dtype):
    """Grid = (batch tiles ['parallel'], point chunks ['arbitrary', innermost]).

    x_ref    : (b_tile, p_chunk, object_dim) act_dtype — points of this chunk.
    weights  : (in, out) in the weight dtype (bf16); biases (1, out) f32.
    out_ref  : (b_tile, out_pad) f32, lane-dense — written on the last point chunk.
    feat_ref : (b_tile, H) f32 VMEM scratch — running max over point chunks.
    """
    pt = pl.program_id(1)
    n_pt = pl.num_programs(1)
    b_tile = out_ref.shape[0]
    hidden = feat_ref.shape[1]
    obj_dim = x_ref.shape[-1]

    def dense(h, w_ref, b_ref):
        # MXU matmul in the (narrow) weight dtype, f32 accumulation, f32 bias.
        return jnp.dot(h.astype(w_ref.dtype), w_ref[...],
                       preferred_element_type=jnp.float32) + b_ref[...]

    def conv_layer(h, w_ref, b_ref):
        # Conv1d(k=1) == per-point Linear; ReLU epilogue.  Activations stay in
        # act_dtype (bf16 on v6e/v7x -> half the vreg/VMEM pressure on the big h).
        return jnp.maximum(dense(h, w_ref, b_ref), 0.0).astype(act_dtype)

    # --- conv branch on this point chunk (rows = b_tile * p_chunk points) ---
    x = x_ref[...].reshape(b_tile * p_chunk, obj_dim)
    h = conv_layer(x, w1_ref, b1_ref)
    h = conv_layer(h, w2_ref, b2_ref)
    h = conv_layer(h, w3_ref, b3_ref)                       # (b_tile*p_chunk, H)

    # --- torch.max(x, 2): running max over point chunks (f32 accumulator) ---
    chunk_max = jnp.max(h.reshape(b_tile, p_chunk, hidden), axis=1)
    chunk_max = chunk_max.astype(jnp.float32)

    @pl.when(pt == 0)
    def _():
        feat_ref[...] = chunk_max

    @pl.when(pt != 0)
    def _():
        feat_ref[...] = jnp.maximum(feat_ref[...], chunk_max)

    # --- classifier MLP once per batch tile, after the last point chunk ---
    @pl.when(pt == n_pt - 1)
    def _():
        m = jnp.maximum(dense(feat_ref[...], wm1_ref, bm1_ref), 0.0)
        m = jnp.maximum(dense(m, wm2_ref, bm2_ref), 0.0)
        out_ref[...] = dense(m, wm3_ref, bm3_ref).astype(out_ref.dtype)


@functools.partial(jax.jit, static_argnames=("b_tile", "weight_dtype"))
def pointnet_forward(x_ncl, params, *, b_tile=None, weight_dtype=jnp.bfloat16):
    """x_ncl: (B, object_dim, nobj) in PyTorch NCL layout -> (B, num_outputs).

    NOTE: params must already be stored transposed as (in, out):
      Conv1d weight (out_ch, in_ch, 1) -> (in_ch, out_ch),
      Linear weight (out, in)          -> (in, out); biases as (1, out).
    Pass weight_dtype=jnp.float32 for exact PyTorch f32 parity.
    """
    (w1, b1, w2, b2, w3, b3, wm1, bm1, wm2, bm2, wm3, bm3) = params
    B, obj_dim, nobj = x_ncl.shape
    hidden = w3.shape[1]
    mlp_hidden = wm1.shape[1]
    num_outputs = wm3.shape[1]

    arch = _tpu_arch_info()
    act_dtype = jnp.bfloat16 if arch["bf16_act"] else jnp.float32
    act_isz = jnp.dtype(act_dtype).itemsize
    w_isz = jnp.dtype(weight_dtype).itemsize

    # --- lane-dense output: pad the final Linear to a 128-wide output ---
    out_pad = _round_up(max(num_outputs, 1), 128)

    # --- batch tile: fill MXU rows for the FLOP-dominant classifier matmuls ---
    bt = arch["mxu_rows"] if b_tile is None else int(b_tile)
    bt = max(8, _round_up(min(bt, _round_up(B, 8)), 8))
    if arch["num_tc"] > 1 and _round_up(B, 8) >= 16:
        # v7x: guarantee >= 2 batch tiles so the 'parallel' axis uses both TCs.
        bt = min(bt, max(8, _round_up(pl.cdiv(B, arch["num_tc"]), 8)))

    # --- bound bt * p_chunk by the per-generation VMEM budget (v7x = 64 MiB):
    #     weights are resident (double-buffered); the conv intermediate h scales
    #     with rows and is the real limiter for large nobj / H. ---
    weight_bytes = 2 * w_isz * (obj_dim * hidden + 2 * hidden * hidden
                                + hidden * mlp_hidden + mlp_hidden * mlp_hidden
                                + mlp_hidden * out_pad)
    bias_bytes = 2 * 4 * (3 * hidden + 2 * mlp_hidden + out_pad)
    feat_bytes = 4 * bt * hidden
    clf_bytes = 4 * bt * (2 * mlp_hidden + out_pad)
    budget = int(arch["vmem"] * 0.6) - weight_bytes - bias_bytes - feat_bytes - clf_bytes
    per_row = (2 * obj_dim * act_isz       # x tile (double-buffered)
               + 4 * hidden * act_isz      # live conv activations (generous)
               + 2 * hidden * 4)           # f32 matmul results pre-cast
    rows_max = max(64, budget // per_row)
    while bt > 8 and bt * 8 > rows_max:
        bt = max(8, _round_up(bt // 2, 8))

    nobj8 = _round_up(nobj, 8)              # sublane-aligned point count
    p_chunk = min(nobj8, max(8, (rows_max // bt) // 8 * 8))
    n_pchunks = pl.cdiv(nobj8, p_chunk)
    nobj_pad = n_pchunks * p_chunk
    n_btiles = pl.cdiv(B, bt)
    b_pad = n_btiles * bt

    # --- layout prep: one fused XLA copy of the (small) input; the kernel does
    #     zero layout work.  Point padding duplicates the last REAL point (max-
    #     safe: zero-padding would pass ReLU(bias) > 0 into the pool); batch
    #     padding is zeros and gets sliced off. ---
    x = jnp.transpose(x_ncl, (0, 2, 1)).astype(act_dtype)   # (B, nobj, obj_dim)
    if nobj_pad != nobj:
        x = jnp.pad(x, ((0, 0), (0, nobj_pad - nobj), (0, 0)), mode="edge")
    if b_pad != B:
        x = jnp.pad(x, ((0, b_pad - B), (0, 0), (0, 0)))

    wm3p = jnp.pad(wm3, ((0, 0), (0, out_pad - num_outputs)))
    bm3p = jnp.pad(bm3, ((0, 0), (0, out_pad - num_outputs)))

    # bf16 weights (halved HBM/VMEM traffic), f32 biases.
    ws = [w.astype(weight_dtype) for w in (w1, w2, w3, wm1, wm2, wm3p)]
    bs = [b.astype(jnp.float32) for b in (b1, b2, b3, bm1, bm2, bm3p)]
    param_list = [ws[0], bs[0], ws[1], bs[1], ws[2], bs[2],
                  ws[3], bs[3], ws[4], bs[4], ws[5], bs[5]]

    def invariant_spec(p):
        # Grid-invariant parameter: same (0, 0) block every step -> no re-DMA.
        return pl.BlockSpec(p.shape, lambda t, q: (0, 0))
    # TODO(synk): for very large mlp_hidden, hold the big classifier weights
    # single-buffered (pl.Buffered(1)) or stage them once from pl.ANY into a
    # persistent VMEM scratch; at these sizes double-buffering is negligible.

    grid_spec = pltpu.PrefetchScalarGridSpec(
        num_scalar_prefetch=0,
        grid=(n_btiles, n_pchunks),
        in_specs=[pl.BlockSpec((bt, p_chunk, obj_dim), lambda t, q: (t, q, 0))]
                 + [invariant_spec(p) for p in param_list],
        out_specs=pl.BlockSpec((bt, out_pad), lambda t, q: (t, 0)),
        scratch_shapes=[pltpu.VMEM((bt, hidden), jnp.float32)],
    )

    flops = 2 * b_pad * (nobj_pad * (obj_dim * hidden + 2 * hidden * hidden)
                         + hidden * mlp_hidden + mlp_hidden * mlp_hidden
                         + mlp_hidden * out_pad)
    bytes_accessed = (int(x.size) * act_isz
                      + sum(int(p.size) * p.dtype.itemsize for p in param_list)
                      + b_pad * out_pad * 4)

    kernel = functools.partial(pointnet_kernel, p_chunk=p_chunk, act_dtype=act_dtype)
    out = pl.pallas_call(
        kernel,
        out_shape=jax.ShapeDtypeStruct((b_pad, out_pad), jnp.float32),
        grid_spec=grid_spec,
        compiler_params=pltpu.CompilerParams(
            dimension_semantics=("parallel", "arbitrary"),
            vmem_limit_bytes=int(min(arch["vmem"] * 3 // 4, 96 << 20)),
        ),
        cost_estimate=pl.CostEstimate(flops=int(flops), transcendentals=0,
                                      bytes_accessed=int(bytes_accessed)),
    )(x, *param_list)

    return out[:B, :num_outputs]


def pointnet_reference(x_ncl, params):
    """Pure-JAX f32 reference with the PyTorch module's exact semantics."""
    (w1, b1, w2, b2, w3, b3, wm1, bm1, wm2, bm2, wm3, bm3) = params
    x = jnp.transpose(x_ncl, (0, 2, 1))               # (B, nobj, object_dim)
    h = jax.nn.relu(x @ w1 + b1)
    h = jax.nn.relu(h @ w2 + b2)
    h = jax.nn.relu(h @ w3 + b3)
    feat = jnp.max(h, axis=1)                         # torch.max(x, 2)
    m = jax.nn.relu(feat @ wm1 + bm1)
    m = jax.nn.relu(m @ wm2 + bm2)
    return m @ wm3 + bm3


def pointnet_reference_matched(x_ncl, params, weight_dtype=jnp.bfloat16,
                               act_dtype=jnp.float32):
    """Reference mirroring the kernel's bf16-weight / act_dtype numerics."""
    (w1, b1, w2, b2, w3, b3, wm1, bm1, wm2, bm2, wm3, bm3) = params

    def dense(h, w, b):
        return jnp.dot(h.astype(weight_dtype), w.astype(weight_dtype),
                       preferred_element_type=jnp.float32) + b

    def conv(h, w, b):
        return jnp.maximum(dense(h, w, b), 0.0).astype(act_dtype)

    x = jnp.transpose(x_ncl, (0, 2, 1)).astype(act_dtype)
    h = conv(x, w1, b1)
    h = conv(h, w2, b2)
    h = conv(h, w3, b3)
    feat = jnp.max(h, axis=1).astype(jnp.float32)
    m = jnp.maximum(dense(feat, wm1, bm1), 0.0)
    m = jnp.maximum(dense(m, wm2, bm2), 0.0)
    return dense(m, wm3, bm3)


def make_params(key, object_dim, hidden, mlp_hidden, num_outputs):
    """Deterministic synthetic init (stand-in for reset_parameters()).

    NOTE: weights are stored pre-transposed as (in, out); a real PyTorch port
    must transpose Conv1d weights from (out_ch, in_ch, 1) and Linear weights
    from (out, in) before calling pointnet_forward.
    """
    ks = jax.random.split(key, 12)

    def w(k, shape, scale):
        return jax.random.uniform(k, shape, jnp.float32, -1.0, 1.0) * scale

    w1 = w(ks[0], (object_dim, hidden), 0.5)
    b1 = w(ks[1], (1, hidden), 1e-3)
    w2 = w(ks[2], (hidden, hidden), 0.3)
    b2 = w(ks[3], (1, hidden), 1e-3)
    w3 = w(ks[4], (hidden, hidden), 0.3)
    b3 = w(ks[5], (1, hidden), 1e-3)
    wm1 = w(ks[6], (hidden, mlp_hidden), 0.25)
    bm1 = w(ks[7], (1, mlp_hidden), 1e-3)
    wm2 = w(ks[8], (mlp_hidden, mlp_hidden), 0.07)
    bm2 = w(ks[9], (1, mlp_hidden), 1e-3)
    wm3 = w(ks[10], (mlp_hidden, num_outputs), 0.1)
    bm3 = w(ks[11], (1, num_outputs), 1e-3)
    return (w1, b1, w2, b2, w3, b3, wm1, bm1, wm2, bm2, wm3, bm3)


if __name__ == "__main__":
    # Small shapes consistent with the module: hidden_sizes=[32, 32], MLP hidden
    # = 512 (hard-coded in PointNetwork.__init__), object_dim=4, batch=2, 8 points.
    # TODO(synk): the PyTorch forward's 1-D/2-D `x.view(...)` branches discard
    # their result (no-op in the original); only the 3-D NCL path is implemented.
    B, object_dim, nobj = 2, 4, 8
    hidden, mlp_hidden, num_outputs = 32, 512, 8

    key = jax.random.PRNGKey(0)
    kx, kp = jax.random.split(key)

    # Input in PyTorch NCL layout: (batch, object_dim, n_objects).
    x = jax.random.normal(kx, (B, object_dim, nobj), dtype=jnp.float32)
    params = make_params(kp, object_dim, hidden, mlp_hidden, num_outputs)

    out = pointnet_forward(x, params)
    out = jax.block_until_ready(out)
    assert out.shape == (B, num_outputs)

    # Tight check vs. a reference using the kernel's exact dtype recipe.
    act_dtype = jnp.bfloat16 if _tpu_arch_info()["bf16_act"] else jnp.float32
    ref_matched = pointnet_reference_matched(x, params, act_dtype=act_dtype)
    assert jnp.allclose(out, ref_matched, atol=2e-3, rtol=1e-2), \
        "mismatch vs dtype-matched reference"

    # Looser sanity bound vs. the full-f32 PyTorch-semantics reference (bf16 error).
    ref_f32 = pointnet_reference(x, params)
    assert jnp.allclose(out, ref_f32, atol=7.5e-2, rtol=5e-2), \
        "mismatch vs f32 reference"

    print("KERNEL_OK")
</pallas_src>

<mosaic_0001>
module attributes {stable_mosaic.version = 11 : i64} {
  func.func @pointnet_kernel(%arg0: i32, %arg1: i32, %arg2: memref<8x8x4xf32, #tpu.memory_space<vmem>>, %arg3: memref<4x32xbf16, #tpu.memory_space<vmem>>, %arg4: memref<1x32xf32, #tpu.memory_space<vmem>>, %arg5: memref<32x32xbf16, #tpu.memory_space<vmem>>, %arg6: memref<1x32xf32, #tpu.memory_space<vmem>>, %arg7: memref<32x32xbf16, #tpu.memory_space<vmem>>, %arg8: memref<1x32xf32, #tpu.memory_space<vmem>>, %arg9: memref<32x512xbf16, #tpu.memory_space<vmem>>, %arg10: memref<1x512xf32, #tpu.memory_space<vmem>>, %arg11: memref<512x512xbf16, #tpu.memory_space<vmem>>, %arg12: memref<1x512xf32, #tpu.memory_space<vmem>>, %arg13: memref<512x128xbf16, #tpu.memory_space<vmem>>, %arg14: memref<1x128xf32, #tpu.memory_space<vmem>>, %arg15: memref<8x128xf32, #tpu.memory_space<vmem>>, %arg16: memref<8x32xf32, #tpu.memory_space<vmem>>) attributes {dimension_semantics = [#tpu.dimension_semantics<parallel>, #tpu.dimension_semantics<arbitrary>], iteration_bounds = array<i64: 1, 1>, scalar_prefetch = 0 : i64, scratch_operands = 1 : i64, tpu.core_type = #tpu.core_type<tc>, window_params = [{transform_indices = @transform_0, window_bounds = array<i64: 8, 8, 4>}, {pipeline_mode = #tpu.pipeline_mode<synchronous>, transform_indices = @transform_1, window_bounds = array<i64: 4, 32>}, {pipeline_mode = #tpu.pipeline_mode<synchronous>, transform_indices = @transform_2, window_bounds = array<i64: 1, 32>}, {pipeline_mode = #tpu.pipeline_mode<synchronous>, transform_indices = @transform_3, window_bounds = array<i64: 32, 32>}, {pipeline_mode = #tpu.pipeline_mode<synchronous>, transform_indices = @transform_4, window_bounds = array<i64: 1, 32>}, {pipeline_mode = #tpu.pipeline_mode<synchronous>, transform_indices = @transform_5, window_bounds = array<i64: 32, 32>}, {pipeline_mode = #tpu.pipeline_mode<synchronous>, transform_indices = @transform_6, window_bounds = array<i64: 1, 32>}, {pipeline_mode = #tpu.pipeline_mode<synchronous>, transform_indices = @transform_7, window_bounds = array<i64: 32, 512>}, {pipeline_mode = #tpu.pipeline_mode<synchronous>, transform_indices = @transform_8, window_bounds = array<i64: 1, 512>}, {pipeline_mode = #tpu.pipeline_mode<synchronous>, transform_indices = @transform_9, window_bounds = array<i64: 512, 512>}, {pipeline_mode = #tpu.pipeline_mode<synchronous>, transform_indices = @transform_10, window_bounds = array<i64: 1, 512>}, {pipeline_mode = #tpu.pipeline_mode<synchronous>, transform_indices = @transform_11, window_bounds = array<i64: 512, 128>}, {pipeline_mode = #tpu.pipeline_mode<synchronous>, transform_indices = @transform_12, window_bounds = array<i64: 1, 128>}, {transform_indices = @transform_13, window_bounds = array<i64: 8, 128>}]} {
    %c0 = arith.constant 0 : index
    %c0_0 = arith.constant 0 : index
    %c0_1 = arith.constant 0 : index
    %0 = vector.load %arg2[%c0, %c0_0, %c0_1] : memref<8x8x4xf32, #tpu.memory_space<vmem>>, vector<8x8x4xf32>
    %1 = vector.shape_cast %0 : vector<8x8x4xf32> to vector<64x4xf32>
    %2 = arith.truncf %1 : vector<64x4xf32> to vector<64x4xbf16>
    %c0_2 = arith.constant 0 : index
    %c0_3 = arith.constant 0 : index
    %3 = vector.load %arg3[%c0_2, %c0_3] : memref<4x32xbf16, #tpu.memory_space<vmem>>, vector<4x32xbf16>
    %cst = arith.constant dense<0.000000e+00> : vector<64x32xf32>
    %4 = tpu.matmul %2, %3, %cst {dimension_numbers = #tpu.dot_dimension_numbers<[1], [0], [0], [1], [0, 0, 1, 1], [], []>} : vector<64x4xbf16>, vector<4x32xbf16>, vector<64x32xf32> -> vector<64x32xf32>
    %c0_4 = arith.constant 0 : index
    %c0_5 = arith.constant 0 : index
    %5 = vector.load %arg4[%c0_4, %c0_5] : memref<1x32xf32, #tpu.memory_space<vmem>>, vector<1x32xf32>
    %6 = vector.broadcast %5 : vector<1x32xf32> to vector<64x32xf32>
    %7 = arith.addf %4, %6 : vector<64x32xf32>
    %cst_6 = arith.constant 0.000000e+00 : f32
    %8 = vector.broadcast %cst_6 : f32 to vector<64x32xf32>
    %9 = arith.maximumf %7, %8 : vector<64x32xf32>
    %10 = arith.truncf %9 : vector<64x32xf32> to vector<64x32xbf16>
    %c0_7 = arith.constant 0 : index
    %c0_8 = arith.constant 0 : index
    %11 = vector.load %arg5[%c0_7, %c0_8] : memref<32x32xbf16, #tpu.memory_space<vmem>>, vector<32x32xbf16>
    %cst_9 = arith.constant dense<0.000000e+00> : vector<64x32xf32>
    %12 = tpu.matmul %10, %11, %cst_9 {dimension_numbers = #tpu.dot_dimension_numbers<[1], [0], [0], [1], [0, 0, 1, 1], [], []>} : vector<64x32xbf16>, vector<32x32xbf16>, vector<64x32xf32> -> vector<64x32xf32>
    %c0_10 = arith.constant 0 : index
    %c0_11 = arith.constant 0 : index
    %13 = vector.load %arg6[%c0_10, %c0_11] : memref<1x32xf32, #tpu.memory_space<vmem>>, vector<1x32xf32>
    %14 = vector.broadcast %13 : vector<1x32xf32> to vector<64x32xf32>
    %15 = arith.addf %12, %14 : vector<64x32xf32>
    %cst_12 = arith.constant 0.000000e+00 : f32
    %16 = vector.broadcast %cst_12 : f32 to vector<64x32xf32>
    %17 = arith.maximumf %15, %16 : vector<64x32xf32>
    %18 = arith.truncf %17 : vector<64x32xf32> to vector<64x32xbf16>
    %c0_13 = arith.constant 0 : index
    %c0_14 = arith.constant 0 : index
    %19 = vector.load %arg7[%c0_13, %c0_14] : memref<32x32xbf16, #tpu.memory_space<vmem>>, vector<32x32xbf16>
    %cst_15 = arith.constant dense<0.000000e+00> : vector<64x32xf32>
    %20 = tpu.matmul %18, %19, %cst_15 {dimension_numbers = #tpu.dot_dimension_numbers<[1], [0], [0], [1], [0, 0, 1, 1], [], []>} : vector<64x32xbf16>, vector<32x32xbf16>, vector<64x32xf32> -> vector<64x32xf32>
    %c0_16 = arith.constant 0 : index
    %c0_17 = arith.constant 0 : index
    %21 = vector.load %arg8[%c0_16, %c0_17] : memref<1x32xf32, #tpu.memory_space<vmem>>, vector<1x32xf32>
    %22 = vector.broadcast %21 : vector<1x32xf32> to vector<64x32xf32>
    %23 = arith.addf %20, %22 : vector<64x32xf32>
    %cst_18 = arith.constant 0.000000e+00 : f32
    %24 = vector.broadcast %cst_18 : f32 to vector<64x32xf32>
    %25 = arith.maximumf %23, %24 : vector<64x32xf32>
    %26 = vector.shape_cast %25 : vector<64x32xf32> to vector<8x8x32xf32>
    %cst_19 = arith.constant dense<0xFF800000> : vector<8x32xf32>
    %27 = vector.multi_reduction <maximumf>, %26, %cst_19 [1] : vector<8x8x32xf32> to vector<8x32xf32>
    %c0_i32 = arith.constant 0 : i32
    %28 = arith.cmpi eq, %arg1, %c0_i32 : i32
    %29 = arith.extui %28 : i1 to i32
    %c0_i32_20 = arith.constant 0 : i32
    %30 = arith.cmpi ne, %29, %c0_i32_20 : i32
    scf.if %30 {
      %c0_25 = arith.constant 0 : index
      %c0_26 = arith.constant 0 : index
      %37 = vector.load %arg16[%c0_25, %c0_26] : memref<8x32xf32, #tpu.memory_space<vmem>>, vector<8x32xf32>
      tpu.vector_store %arg16[%c0_25, %c0_26], %27 {strides = array<i32>} : memref<8x32xf32, #tpu.memory_space<vmem>>, vector<8x32xf32>,
    } else {
    }
    %c0_i32_21 = arith.constant 0 : i32
    %31 = arith.cmpi ne, %arg1, %c0_i32_21 : i32
    %32 = arith.extui %31 : i1 to i32
    %c0_i32_22 = arith.constant 0 : i32
    %33 = arith.cmpi ne, %32, %c0_i32_22 : i32
    scf.if %33 {
      %c0_25 = arith.constant 0 : index
      %c0_26 = arith.constant 0 : index
      %37 = vector.load %arg16[%c0_25, %c0_26] : memref<8x32xf32, #tpu.memory_space<vmem>>, vector<8x32xf32>
      %38 = arith.maximumf %37, %27 : vector<8x32xf32>
      %c0_27 = arith.constant 0 : index
      %c0_28 = arith.constant 0 : index
      %39 = vector.load %arg16[%c0_27, %c0_28] : memref<8x32xf32, #tpu.memory_space<vmem>>, vector<8x32xf32>
      tpu.vector_store %arg16[%c0_27, %c0_28], %38 {strides = array<i32>} : memref<8x32xf32, #tpu.memory_space<vmem>>, vector<8x32xf32>,
    } else {
    }
    %c0_i32_23 = arith.constant 0 : i32
    %34 = arith.cmpi eq, %arg1, %c0_i32_23 : i32
    %35 = arith.extui %34 : i1 to i32
    %c0_i32_24 = arith.constant 0 : i32
    %36 = arith.cmpi ne, %35, %c0_i32_24 : i32
    scf.if %36 {
      %c0_25 = arith.constant 0 : index
      %c0_26 = arith.constant 0 : index
      %37 = vector.load %arg16[%c0_25, %c0_26] : memref<8x32xf32, #tpu.memory_space<vmem>>, vector<8x32xf32>
      %38 = arith.truncf %37 : vector<8x32xf32> to vector<8x32xbf16>
      %c0_27 = arith.constant 0 : index
      %c0_28 = arith.constant 0 : index
      %39 = vector.load %arg9[%c0_27, %c0_28] : memref<32x512xbf16, #tpu.memory_space<vmem>>, vector<32x512xbf16>
      %cst_29 = arith.constant dense<0.000000e+00> : vector<8x512xf32>
      %40 = tpu.matmul %38, %39, %cst_29 {dimension_numbers = #tpu.dot_dimension_numbers<[1], [0], [0], [1], [0, 0, 1, 1], [], []>} : vector<8x32xbf16>, vector<32x512xbf16>, vector<8x512xf32> -> vector<8x512xf32>
      %c0_30 = arith.constant 0 : index
      %c0_31 = arith.constant 0 : index
      %41 = vector.load %arg10[%c0_30, %c0_31] : memref<1x512xf32, #tpu.memory_space<vmem>>, vector<1x512xf32>
      %42 = vector.broadcast %41 : vector<1x512xf32> to vector<8x512xf32>
      %43 = arith.addf %40, %42 : vector<8x512xf32>
      %cst_32 = arith.constant 0.000000e+00 : f32
      %44 = vector.broadcast %cst_32 : f32 to vector<8x512xf32>
      %45 = arith.maximumf %43, %44 : vector<8x512xf32>
      %46 = arith.truncf %45 : vector<8x512xf32> to vector<8x512xbf16>
      %c0_33 = arith.constant 0 : index
      %c0_34 = arith.constant 0 : index
      %47 = vector.load %arg11[%c0_33, %c0_34] : memref<512x512xbf16, #tpu.memory_space<vmem>>, vector<512x512xbf16>
      %cst_35 = arith.constant dense<0.000000e+00> : vector<8x512xf32>
      %48 = tpu.matmul %46, %47, %cst_35 {dimension_numbers = #tpu.dot_dimension_numbers<[1], [0], [0], [1], [0, 0, 1, 1], [], []>} : vector<8x512xbf16>, vector<512x512xbf16>, vector<8x512xf32> -> vector<8x512xf32>
      %c0_36 = arith.constant 0 : index
      %c0_37 = arith.constant 0 : index
      %49 = vector.load %arg12[%c0_36, %c0_37] : memref<1x512xf32, #tpu.memory_space<vmem>>, vector<1x512xf32>
      %50 = vector.broadcast %49 : vector<1x512xf32> to vector<8x512xf32>
      %51 = arith.addf %48, %50 : vector<8x512xf32>
      %cst_38 = arith.constant 0.000000e+00 : f32
      %52 = vector.broadcast %cst_38 : f32 to vector<8x512xf32>
      %53 = arith.maximumf %51, %52 : vector<8x512xf32>
      %54 = arith.truncf %53 : vector<8x512xf32> to vector<8x512xbf16>
      %c0_39 = arith.constant 0 : index
      %c0_40 = arith.constant 0 : index
      %55 = vector.load %arg13[%c0_39, %c0_40] : memref<512x128xbf16, #tpu.memory_space<vmem>>, vector<512x128xbf16>
      %cst_41 = arith.constant dense<0.000000e+00> : vector<8x128xf32>
      %56 = tpu.matmul %54, %55, %cst_41 {dimension_numbers = #tpu.dot_dimension_numbers<[1], [0], [0], [1], [0, 0, 1, 1], [], []>} : vector<8x512xbf16>, vector<512x128xbf16>, vector<8x128xf32> -> vector<8x128xf32>
      %c0_42 = arith.constant 0 : index
      %c0_43 = arith.constant 0 : index
      %57 = vector.load %arg14[%c0_42, %c0_43] : memref<1x128xf32, #tpu.memory_space<vmem>>, vector<1x128xf32>
      %58 = vector.broadcast %57 : vector<1x128xf32> to vector<8x128xf32>
      %59 = arith.addf %56, %58 : vector<8x128xf32>
      %c0_44 = arith.constant 0 : index
      %c0_45 = arith.constant 0 : index
      %60 = vector.load %arg15[%c0_44, %c0_45] : memref<8x128xf32, #tpu.memory_space<vmem>>, vector<8x128xf32>
      tpu.vector_store %arg15[%c0_44, %c0_45], %59 {strides = array<i32>} : memref<8x128xf32, #tpu.memory_space<vmem>>, vector<8x128xf32>,
    } else {
    }
    return
  }
  func.func @transform_0(%arg0: i32, %arg1: i32) -> (i32, i32, i32) {
    %c0_i32 = arith.constant 0 : i32
    %c0_i32_0 = arith.constant 0 : i32
    return %arg0, %arg1, %c0_i32 : i32, i32, i32
  }
  func.func @transform_1(%arg0: i32, %arg1: i32) -> (i32, i32) {
    %c0_i32 = arith.constant 0 : i32
    %c0_i32_0 = arith.constant 0 : i32
    %c0_i32_1 = arith.constant 0 : i32
    return %c0_i32, %c0_i32_0 : i32, i32
  }
  func.func @transform_2(%arg0: i32, %arg1: i32) -> (i32, i32) {
    %c0_i32 = arith.constant 0 : i32
    %c0_i32_0 = arith.constant 0 : i32
    %c0_i32_1 = arith.constant 0 : i32
    return %c0_i32, %c0_i32_0 : i32, i32
  }
  func.func @transform_3(%arg0: i32, %arg1: i32) -> (i32, i32) {
    %c0_i32 = arith.constant 0 : i32
    %c0_i32_0 = arith.constant 0 : i32
    %c0_i32_1 = arith.constant 0 : i32
    return %c0_i32, %c0_i32_0 : i32, i32
  }
  func.func @transform_4(%arg0: i32, %arg1: i32) -> (i32, i32) {
    %c0_i32 = arith.constant 0 : i32
    %c0_i32_0 = arith.constant 0 : i32
    %c0_i32_1 = arith.constant 0 : i32
    return %c0_i32, %c0_i32_0 : i32, i32
  }
  func.func @transform_5(%arg0: i32, %arg1: i32) -> (i32, i32) {
    %c0_i32 = arith.constant 0 : i32
    %c0_i32_0 = arith.constant 0 : i32
    %c0_i32_1 = arith.constant 0 : i32
    return %c0_i32, %c0_i32_0 : i32, i32
  }
  func.func @transform_6(%arg0: i32, %arg1: i32) -> (i32, i32) {
    %c0_i32 = arith.constant 0 : i32
    %c0_i32_0 = arith.constant 0 : i32
    %c0_i32_1 = arith.constant 0 : i32
    return %c0_i32, %c0_i32_0 : i32, i32
  }
  func.func @transform_7(%arg0: i32, %arg1: i32) -> (i32, i32) {
    %c0_i32 = arith.constant 0 : i32
    %c0_i32_0 = arith.constant 0 : i32
    %c0_i32_1 = arith.constant 0 : i32
    return %c0_i32, %c0_i32_0 : i32, i32
  }
  func.func @transform_8(%arg0: i32, %arg1: i32) -> (i32, i32) {
    %c0_i32 = arith.constant 0 : i32
    %c0_i32_0 = arith.constant 0 : i32
    %c0_i32_1 = arith.constant 0 : i32
    return %c0_i32, %c0_i32_0 : i32, i32
  }
  func.func @transform_9(%arg0: i32, %arg1: i32) -> (i32, i32) {
    %c0_i32 = arith.constant 0 : i32
    %c0_i32_0 = arith.constant 0 : i32
    %c0_i32_1 = arith.constant 0 : i32
    return %c0_i32, %c0_i32_0 : i32, i32
  }
  func.func @transform_10(%arg0: i32, %arg1: i32) -> (i32, i32) {
    %c0_i32 = arith.constant 0 : i32
    %c0_i32_0 = arith.constant 0 : i32
    %c0_i32_1 = arith.constant 0 : i32
    return %c0_i32, %c0_i32_0 : i32, i32
  }
  func.func @transform_11(%arg0: i32, %arg1: i32) -> (i32, i32) {
    %c0_i32 = arith.constant 0 : i32
    %c0_i32_0 = arith.constant 0 : i32
    %c0_i32_1 = arith.constant 0 : i32
    return %c0_i32, %c0_i32_0 : i32, i32
  }
  func.func @transform_12(%arg0: i32, %arg1: i32) -> (i32, i32) {
    %c0_i32 = arith.constant 0 : i32
    %c0_i32_0 = arith.constant 0 : i32
    %c0_i32_1 = arith.constant 0 : i32
    return %c0_i32, %c0_i32_0 : i32, i32
  }
  func.func @transform_13(%arg0: i32, %arg1: i32) -> (i32, i32) {
    %c0_i32 = arith.constant 0 : i32
    %c0_i32_0 = arith.constant 0 : i32
    return %arg0, %c0_i32 : i32, i32
  }
}

</mosaic_0001>

<bundles_post_ra>
// kernel: pointnet_forward.1
= control target key start
LH: loop header
LB: loop body
LE: loop exit
PB: predicated region body
PF: predicated region fallthrough
CT: control target
= control target key end

     0   :  { %vm78_vm0 = vcmask 1041408   ;;  %vm65_vm1 = vcmask 31744   ;;  %vm182_vm2 = vcmask 261120   ;;  %vm448_vm3 = vcmask 1041409   ;;  %s3206_s1 = inlined_call_operand.vmem [shape: bf16[4,32], index: 1, kind: input, shape index: {}]   ;;  %s3207_s0 = inlined_call_operand.vmem [shape: f32[8,8,4], index: 0, kind: input, shape index: {}]   ;;  %s3208_s3 = inlined_call_operand.vmem [shape: bf16[32,32], index: 3, kind: input, shape index: {}]   ;;  %s3209_s2 = inlined_call_operand.vmem [shape: f32[1,32], index: 2, kind: input, shape index: {}]   ;;  %s3210_s5 = inlined_call_operand.vmem [shape: bf16[32,32], index: 5, kind: input, shape index: {}]   ;;  %s3211_s4 = inlined_call_operand.vmem [shape: f32[1,32], index: 4, kind: input, shape index: {}]   ;;  %s3212_s7 = inlined_call_operand.vmem [shape: bf16[32,512], index: 7, kind: input, shape index: {}]   ;;  %s3213_s9 = inlined_call_operand.vmem [shape: bf16[512,512], index: 9, kind: input, shape index: {}]   ;;  %s3214_s6 = inlined_call_operand.vmem [shape: f32[1,32], index: 6, kind: input, shape index: {}]   ;;  %s3215_s11 = inlined_call_operand.vmem [shape: bf16[512,128], index: 11, kind: input, shape index: {}]   ;;  %s3216_s8 = inlined_call_operand.vmem [shape: f32[1,512], index: 8, kind: input, shape index: {}]   ;;  %s3217_s10 = inlined_call_operand.vmem [shape: f32[1,512], index: 10, kind: input, shape index: {}]   ;;  %s3218_s12 = inlined_call_operand.vmem [shape: f32[1,128], index: 12, kind: input, shape index: {}]   ;;  %s3219_s13 = inlined_call_operand.vmem [shape: f32[8,128], index: 13, kind: output, shape index: {}]  }
   0x1   :  { %v57_v0 = vld [vmem:[%s3206_s1] sm:$0x3]  ;;  %v46_v2 = vld [vmem:[%s3207_s0 + $0x8] sm:$0xff]  ;;  %v47_v5 = vld [vmem:[%s3207_s0 + $0x10] sm:$0xff]  ;;  %vm450_vm4 = vcmask 1042434   ;;  %vm452_vm5 = vcmask 1043459  }
   0x2   :  { %v45_v1 = vld [vmem:[%s3207_s0] sm:$0xff]  ;;  %2273 = vmatprep.subr.msk.bf16.mxu0 %vm78_vm0, %v57_v0  ;;  %v80_v3 = vsel %vm78_vm0, %v57_v0, 0  ;;  %v48_v6 = vld [vmem:[%s3207_s0 + $0x18] sm:$0xff]  ;;  %v50_v9 = vld [vmem:[%s3207_s0 + $0x28] sm:$0xff]  ;;  %vm454_vm6 = vcmask 1044484   ;;  %vm456_vm7 = vcmask 1045509  }
   0x3   :  { %v53_v4 = vpack.c.bf16 %v46_v2, %v45_v1  ;;  %v49_v7 = vld [vmem:[%s3207_s0 + $0x20] sm:$0xff]  ;;  %2224 = vmatpush3.bf16.msra.mxu0 %v80_v3  ;;  %v54_v8 = vpack.c.bf16 %v48_v6, %v47_v5  ;;  %v51_v12 = vld [vmem:[%s3207_s0 + $0x30] sm:$0xff]  ;;  %v52_v13 = vld [vmem:[%s3207_s0 + $0x38] sm:$0xff]  ;;  %vm458_vm8 = vcmask 1046534   ;;  %vm460_vm9 = vcmask 1047559  }
   0x4   :  { %v55_v10 = vpack.c.bf16 %v50_v9, %v49_v7  ;;  %v2275_v11 = vld [vmem:[%s3208_s3] sm:$0xff]   ;;  %v56_v14 = vpack.c.bf16 %v52_v13, %v51_v12  ;;  %v2276_v15 = vld [vmem:[%s3208_s3 + $0x8] sm:$0xff]  }
   0x5   :  { %2225 = vmatprep.mubr.msk.bf16.mxu0 %vm65_vm1, %v53_v4  ;;  %2233 = vmatprep.subr.bf16.mxu0 %v2275_v11  ;;  %v1972_v16 = vld [vmem:[%s3209_s2] ss:$0 sm:$0xff]  ;;  %v2278_v46 = vld [vmem:[%s3210_s5 + $0x8] sm:$0xff]   ;;  %v2281_v13 = vld [vmem:[%s3212_s7 + $0x4] ss:$16 sps:$4 sm:$0xff]  }
   0x6   :  { %2226 = vmatmul.mubr.msk.bf16.vlgmr.msra.gmra.mrb[0].mxu0 %vm65_vm1, %v54_v8  ;;  %2257 = vmatprep.subr.bf16.mxu1 %v2275_v11  ;;  %v2277_v45 = vld [vmem:[%s3210_s5] sm:$0xff]  }
   0x7   :  { %2229 = vmatprep.mubr.msk.bf16.mxu0 %vm65_vm1, %v55_v10  ;;  %2234 = vmatpush3.bf16.msra.mxu0 %v2275_v11  ;;  %v1977_v47 = vld [vmem:[%s3211_s4] ss:$0 sm:$0xff] }
   0x8   :  { %2259 = vmatpush3.bf16.msra.mxu1 %v2275_v11  ;;  %2235 = vmatprep.subr.bf16.mxu0 %v2276_v15  ;;  %v2279_v12 = vld [vmem:[%s3212_s7] ss:$16 sps:$4 sm:$0xff]  }
   0x9   :  { %2258 = vmatprep.subr.bf16.mxu1 %v2276_v15 }
   0xb   :  { %2236 = vmatpush3.bf16.msra.mxu0 %v2276_v15 }
   0xc   :  { %2260 = vmatpush3.bf16.msra.mxu1 %v2276_v15  ;;  %2245 = vmatprep.subr.bf16.mxu0 %v2277_v45  ;;  %v2284_v15 = vld [vmem:[%s3212_s7 + $0x24] ss:$16 sps:$4 sm:$0xff]  }
   0xd   :  { %572 = vmatprep.subr.bf16.mxu1 %v2281_v13 }
   0xe   :  { %2230 = vmatmul.mubr.msk.bf16.gmra.mrb[4].mxu0 %vm65_vm1, %v56_v14  ;;  %v2515_v14 = vmov 0  }
  0xd9   :  { %v2227_v17 = vpop.f32.mrb[0].mxu0 }
  0xda   :  { %v125_v18 = vadd.f32 %v2227_v17, %v1972_v16  ;;  %v116_v19 = vpop.f32.mrb[1].mxu0  ;;  %v2287_v17 = vld [vmem:[%s3212_s7 + $0xc] ss:$16 sps:$4 sm:$0xff]  }
  0xdb   :  { %v117_v20 = vadd.f32 %v1972_v16, %v116_v19  ;;  %v2228_v21 = vpop.f32.mrb[2].mxu0  ;;  %v2293_v19 = vld [vmem:[%s3213_s9 + $0x4] ss:$16 sps:$4 sm:$0xff]  }
  0xdc   :  { %v128_v22 = vadd.f32 %v2228_v21, %v1972_v16  ;;  %v119_v23 = vpop.f32.mrb[3].mxu0  ;;  %v149_v25 = vmax.f32 %v125_v18, 0.0  ;;  %v2291_v18 = vld [vmem:[%s3213_s9] ss:$16 sps:$4 sm:$0xff]  }
  0xdd   :  { %v120_v24 = vadd.f32 %v1972_v16, %v119_v23  ;;  %v147_v27 = vmax.f32 %v117_v20, 0.0  ;;  %v2299_v20 = vld [vmem:[%s3213_s9 + $0x24] ss:$16 sps:$4 sm:$0xff]   ;;  %v2297_v21 = vld [vmem:[%s3213_s9 + $0x20] ss:$16 sps:$4 sm:$0xff]  }
  0xde   :  { %v150_v26 = vmax.f32 %v128_v22, 0.0  ;;  %v2305_v22 = vld [vmem:[%s3213_s9 + $0x44] ss:$16 sps:$4 sm:$0xff]   ;;  %v2303_v23 = vld [vmem:[%s3213_s9 + $0x40] ss:$16 sps:$4 sm:$0xff]  }
  0xdf   :  { %v148_v28 = vmax.f32 %v120_v24, 0.0  ;;  %v2311_v24 = vld [vmem:[%s3213_s9 + $0x64] ss:$16 sps:$4 sm:$0xff]  }
  0xe0   :  { %v156_v29 = vpack.c.bf16 %v150_v26, %v149_v25  ;;  %v2309_v25 = vld [vmem:[%s3213_s9 + $0x60] ss:$16 sps:$4 sm:$0xff]   ;;  %v2317_v26 = vld [vmem:[%s3213_s9 + $0x84] ss:$16 sps:$4 sm:$0xff]  }
  0xe1   :  { %v155_v30 = vpack.c.bf16 %v148_v28, %v147_v27  ;;  %v2231_v31 = vpop.f32.mrb[4].mxu0  ;;  %v2315_v27 = vld [vmem:[%s3213_s9 + $0x80] ss:$16 sps:$4 sm:$0xff]   ;;  %v2323_v28 = vld [vmem:[%s3213_s9 + $0xa4] ss:$16 sps:$4 sm:$0xff]  }
  0xe2   :  { %v141_v32 = vadd.f32 %v2231_v31, %v1972_v16  ;;  %v132_v33 = vpop.f32.mrb[5].mxu0  ;;  %v2327_v31 = vld [vmem:[%s3213_s9 + $0xc0] ss:$16 sps:$4 sm:$0xff]  }
  0xe3   :  { %v133_v34 = vadd.f32 %v1972_v16, %v132_v33  ;;  %v2232_v35 = vpop.f32.mrb[6].mxu0  ;;  %2237 = vmatprep.mubr.msk.bf16.mxu0 %vm182_vm2, %v155_v30  ;;  %v2329_v30 = vld [vmem:[%s3213_s9 + $0xc4] ss:$16 sps:$4 sm:$0xff]   ;;  %v2333_v33 = vld [vmem:[%s3213_s9 + $0xe0] ss:$16 sps:$4 sm:$0xff]  }
  0xe4   :  { %v144_v36 = vadd.f32 %v2232_v35, %v1972_v16  ;;  %v135_v37 = vpop.f32.mrb[7].mxu0  ;;  %2238 = vmatmul.mubr.msk.bf16.vlgmr.msra.gmra.mrb[8].mxu0 %vm182_vm2, %v156_v29  ;;  %v153_v39 = vmax.f32 %v141_v32, 0.0  ;;  %v2321_v29 = vld [vmem:[%s3213_s9 + $0xa0] ss:$16 sps:$4 sm:$0xff]   ;;  %v2335_v32 = vld [vmem:[%s3213_s9 + $0xe4] ss:$16 sps:$4 sm:$0xff]  }
  0xe5   :  { %v136_v38 = vadd.f32 %v1972_v16, %v135_v37  ;;  %v151_v41 = vmax.f32 %v133_v34, 0.0  ;;  %2246 = vmatpush3.bf16.msra.mxu0 %v2277_v45  ;;  %v2282_v16 = vld [vmem:[%s3212_s7 + $0x20] ss:$16 sps:$4 sm:$0xff]   ;;  %v2341_v34 = vld [vmem:[%s3213_s9 + $0x104] ss:$16 sps:$4 sm:$0xff]  }
  0xe6   :  { %v154_v40 = vmax.f32 %v144_v36, 0.0  ;;  %2247 = vmatprep.subr.bf16.mxu0 %v2278_v46  ;;  %v2339_v35 = vld [vmem:[%s3213_s9 + $0x100] ss:$16 sps:$4 sm:$0xff]   ;;  %v2347_v36 = vld [vmem:[%s3213_s9 + $0x124] ss:$16 sps:$4 sm:$0xff]  }
  0xe7   :  { %v152_v42 = vmax.f32 %v136_v38, 0.0  ;;  %v2345_v37 = vld [vmem:[%s3213_s9 + $0x120] ss:$16 sps:$4 sm:$0xff]   ;;  %v2353_v38 = vld [vmem:[%s3213_s9 + $0x144] ss:$16 sps:$4 sm:$0xff]  }
  0xe8   :  { %v158_v43 = vpack.c.bf16 %v154_v40, %v153_v39  ;;  %v2351_v39 = vld [vmem:[%s3213_s9 + $0x140] ss:$16 sps:$4 sm:$0xff]   ;;  %v2359_v40 = vld [vmem:[%s3213_s9 + $0x164] ss:$16 sps:$4 sm:$0xff]  }
  0xe9   :  { %v157_v44 = vpack.c.bf16 %v152_v42, %v151_v41  ;;  %2248 = vmatpush3.bf16.msra.mxu0 %v2278_v46  ;;  %v2357_v41 = vld [vmem:[%s3213_s9 + $0x160] ss:$16 sps:$4 sm:$0xff]   ;;  %v2365_v42 = vld [vmem:[%s3213_s9 + $0x184] ss:$16 sps:$4 sm:$0xff]  }
  0xea   :  { %1452 = vmatprep.subr.bf16.mxu0 %v2293_v19  ;;  %v2369_v45 = vld [vmem:[%s3213_s9 + $0x1a0] ss:$16 sps:$4 sm:$0xff]  }
  0xeb   :  { %2241 = vmatprep.mubr.msk.bf16.mxu1 %vm182_vm2, %v157_v44  ;;  %v2371_v44 = vld [vmem:[%s3213_s9 + $0x1a4] ss:$16 sps:$4 sm:$0xff]   ;;  %v1984_v46 = vld [vmem:[%s3214_s6] ss:$0 sm:$0xff] }
  0xec   :  { %2242 = vmatmul.mubr.msk.bf16.vlgmr.msra.gmra.mrb[0].mxu1 %vm182_vm2, %v158_v43  ;;  %v2363_v43 = vld [vmem:[%s3213_s9 + $0x180] ss:$16 sps:$4 sm:$0xff]  }
  0xed   :  { %604 = vmatprep.mubr.bf16.mxu1 %v2515_v14  ;;  %573 = vmatpush1.bf16.msra.mxu1 %v2279_v12 }
  0xee   :  { %574 = vmatprep.subr.bf16.mxu1 %v2284_v15 }
  0xf1   :  { %575 = vmatpush1.bf16.msra.mxu1 %v2282_v16 }
  0xf2   :  { %613 = vmatprep.subr.bf16.mxu1 %v2287_v17 }
 0x1b7   :  { %v2239_v48 = vpop.f32.mrb[8].mxu0 }
 0x1b8   :  { %v238_v49 = vadd.f32 %v2239_v48, %v1977_v47  ;;  %v229_v50 = vpop.f32.mrb[9].mxu0 }
 0x1b9   :  { %v230_v51 = vadd.f32 %v1977_v47, %v229_v50  ;;  %v2240_v52 = vpop.f32.mrb[10].mxu0 }
 0x1ba   :  { %v241_v53 = vadd.f32 %v2240_v52, %v1977_v47  ;;  %v232_v54 = vpop.f32.mrb[11].mxu0  ;;  %v262_v56 = vmax.f32 %v238_v49, 0.0 }
 0x1bb   :  { %v233_v55 = vadd.f32 %v1977_v47, %v232_v54  ;;  %v260_v58 = vmax.f32 %v230_v51, 0.0 }
 0x1bc   :  { %v263_v57 = vmax.f32 %v241_v53, 0.0 }
 0x1bd   :  { %v261_v59 = vmax.f32 %v233_v55, 0.0 }
 0x1be   :  { %v269_v60 = vpack.c.bf16 %v263_v57, %v262_v56 }
 0x1bf   :  { %v268_v61 = vpack.c.bf16 %v261_v59, %v260_v58  ;;  %v2243_v62 = vpop.f32.mrb[0].mxu1 }
 0x1c0   :  { %v254_v63 = vadd.f32 %v2243_v62, %v1977_v47  ;;  %v245_v0 = vpop.f32.mrb[1].mxu1 }
 0x1c1   :  { %v246_v1 = vadd.f32 %v1977_v47, %v245_v0  ;;  %v2244_v2 = vpop.f32.mrb[2].mxu1  ;;  %2249 = vmatprep.mubr.msk.bf16.mxu0 %vm182_vm2, %v268_v61 }
 0x1c2   :  { %v257_v3 = vadd.f32 %v2244_v2, %v1977_v47  ;;  %v248_v4 = vpop.f32.mrb[3].mxu1  ;;  %2250 = vmatmul.mubr.msk.bf16.vlgmr.msra.gmra.mrb[12].mxu0 %vm182_vm2, %v269_v60  ;;  %v266_v6 = vmax.f32 %v254_v63, 0.0 }
 0x1c3   :  { %v249_v5 = vadd.f32 %v1977_v47, %v248_v4  ;;  %v264_v8 = vmax.f32 %v246_v1, 0.0  ;;  %1453 = vmatpush1.bf16.msra.mxu0 %v2291_v18 }
 0x1c4   :  { %v267_v7 = vmax.f32 %v257_v3, 0.0  ;;  %1454 = vmatprep.subr.bf16.mxu0 %v2299_v20 }
 0x1c5   :  { %v265_v9 = vmax.f32 %v249_v5, 0.0 }
 0x1c6   :  { %v271_v10 = vpack.c.bf16 %v267_v7, %v266_v6 }
 0x1c7   :  { %v270_v11 = vpack.c.bf16 %v265_v9, %v264_v8  ;;  %1455 = vmatpush1.bf16.msra.mxu0 %v2297_v21 }
 0x1c8   :  { %1456 = vmatprep.subr.bf16.mxu0 %v2305_v22 }
 0x1c9   :  { %2253 = vmatprep.mubr.msk.bf16.mxu0 %vm182_vm2, %v270_v11 }
 0x1ca   :  { %2254 = vmatmul.mubr.msk.bf16.gmra.mrb[16].mxu0 %vm182_vm2, %v271_v10 }
 0x1cb   :  { %1457 = vmatpush1.bf16.msra.mxu0 %v2303_v23 }
 0x1cc   :  { %1458 = vmatprep.subr.bf16.mxu0 %v2311_v24 }
 0x1cf   :  { %1459 = vmatpush1.bf16.msra.mxu0 %v2309_v25 }
 0x1d0   :  { %1460 = vmatprep.subr.bf16.mxu0 %v2317_v26 }
 0x1d3   :  { %1461 = vmatpush1.bf16.msra.mxu0 %v2315_v27 }
 0x1d4   :  { %1462 = vmatprep.subr.bf16.mxu0 %v2323_v28 }
 0x1d7   :  { %1463 = vmatpush1.bf16.msra.mxu0 %v2321_v29 }
 0x1d8   :  { %1464 = vmatprep.subr.bf16.mxu0 %v2329_v30 }
 0x1db   :  { %1465 = vmatpush1.bf16.msra.mxu0 %v2327_v31 }
 0x1dc   :  { %1466 = vmatprep.subr.bf16.mxu0 %v2335_v32 }
 0x1df   :  { %1467 = vmatpush1.bf16.msra.mxu0 %v2333_v33 }
 0x1e0   :  { %1468 = vmatprep.subr.bf16.mxu0 %v2341_v34 }
 0x1e3   :  { %1469 = vmatpush1.bf16.msra.mxu0 %v2339_v35 }
 0x1e4   :  { %1470 = vmatprep.subr.bf16.mxu0 %v2347_v36 }
 0x1e7   :  { %1471 = vmatpush1.bf16.msra.mxu0 %v2345_v37 }
 0x1e8   :  { %1472 = vmatprep.subr.bf16.mxu0 %v2353_v38 }
 0x1eb   :  { %1473 = vmatpush1.bf16.msra.mxu0 %v2351_v39 }
 0x1ec   :  { %1474 = vmatprep.subr.bf16.mxu0 %v2359_v40 }
 0x1ef   :  { %1475 = vmatpush1.bf16.msra.mxu0 %v2357_v41 }
 0x1f0   :  { %1476 = vmatprep.subr.bf16.mxu0 %v2365_v42 }
 0x1f3   :  { %1477 = vmatpush1.bf16.msra.mxu0 %v2363_v43 }
 0x1f4   :  { %1478 = vmatprep.subr.bf16.mxu0 %v2371_v44 }
 0x1f7   :  { %1479 = vmatpush1.bf16.msra.mxu0 %v2369_v45 }
 0x295   :  { %v2251_v47 = vpop.f32.mrb[12].mxu0 }
 0x296   :  { %v350_v48 = vadd.f32 %v2251_v47, %v1984_v46  ;;  %v341_v49 = vpop.f32.mrb[13].mxu0 }
 0x297   :  { %v342_v50 = vadd.f32 %v1984_v46, %v341_v49  ;;  %v2252_v51 = vpop.f32.mrb[14].mxu0 }
 0x298   :  { %v374_v52 = vmax.f32 %v350_v48, 0.0  ;;  %v353_v53 = vadd.f32 %v2252_v51, %v1984_v46  ;;  %v344_v54 = vpop.f32.mrb[15].mxu0 }
 0x299   :  { %v372_v55 = vmax.f32 %v342_v50, 0.0  ;;  %v345_v56 = vadd.f32 %v1984_v46, %v344_v54 }
 0x29a   :  { %v394_v57 = vsel %vm182_vm2, %v374_v52, -inf  ;;  %v375_v58 = vmax.f32 %v353_v53, 0.0 }
 0x29b   :  { %v395_v59 = vrot.slane %v394_v57, 4  ;;  %v380_v60 = vsel %vm182_vm2, %v372_v55, -inf  ;;  %v373_v61 = vmax.f32 %v345_v56, 0.0 }
 0x29c   :  { %v381_v62 = vrot.slane %v380_v60, 4  ;;  %v401_v63 = vsel %vm182_vm2, %v375_v58, -inf }
 0x29d   :  { %v396_v0 = vmax.f32 %v394_v57, %v395_v59  ;;  %v402_v1 = vrot.slane %v401_v63, 4  ;;  %v387_v2 = vsel %vm182_vm2, %v373_v61, -inf  ;;  %v2255_v3 = vpop.f32.mrb[16].mxu0 }
 0x29e   :  { %v382_v4 = vmax.f32 %v380_v60, %v381_v62  ;;  %v388_v5 = vrot.slane %v387_v2, 4  ;;  %v366_v6 = vadd.f32 %v2255_v3, %v1984_v46  ;;  %v357_v7 = vpop.f32.mrb[17].mxu0 }
 0x29f   :  { %v397_v8 = vrot.slane %v396_v0, 2  ;;  %v403_v9 = vmax.f32 %v401_v63, %v402_v1  ;;  %v358_v10 = vadd.f32 %v1984_v46, %v357_v7  ;;  %v2256_v11 = vpop.f32.mrb[18].mxu0 }
 0x2a0   :  { %v383_v12 = vrot.slane %v382_v4, 2  ;;  %v389_v13 = vmax.f32 %v387_v2, %v388_v5  ;;  %v378_v15 = vmax.f32 %v366_v6, 0.0  ;;  %v369_v16 = vadd.f32 %v2256_v11, %v1984_v46  ;;  %v360_v17 = vpop.f32.mrb[19].mxu0  ;;  %v2288_v11 = vld [vmem:[%s3212_s7 + $0x28] ss:$16 sps:$4 sm:$0xff]  }
 0x2a1   :  { %v398_v18 = vmax.f32 %v396_v0, %v397_v8  ;;  %v404_v19 = vrot.slane %v403_v9, 2  ;;  %v376_v20 = vmax.f32 %v358_v10, 0.0  ;;  %v361_v21 = vadd.f32 %v1984_v46, %v360_v17  ;;  %v2285_v8 = vld [vmem:[%s3212_s7 + $0x8] ss:$16 sps:$4 sm:$0xff]   ;;  %v2290_v10 = vld [vmem:[%s3212_s7 + $0x2c] ss:$16 sps:$4 sm:$0xff]  }
 0x2a2   :  { %v384_v22 = vmax.f32 %v382_v4, %v383_v12  ;;  %v390_v23 = vrot.slane %v389_v13, 2  ;;  %v422_v24 = vsel %vm182_vm2, %v378_v15, -inf  ;;  %v379_v25 = vmax.f32 %v369_v16, 0.0  ;;  %v2296_v12 = vld [vmem:[%s3213_s9 + $0xc] ss:$16 sps:$4 sm:$0xff]  }
 0x2a3   :  { %v405_v26 = vmax.f32 %v403_v9, %v404_v19  ;;  %v423_v27 = vrot.slane %v422_v24, 4  ;;  %v408_v28 = vsel %vm182_vm2, %v376_v20, -inf  ;;  %v399_v33 = vrot.slane %v398_v18, 1  ;;  %v2302_v15 = vld [vmem:[%s3213_s9 + $0x2c] ss:$16 sps:$4 sm:$0xff]  }
 0x2a4   :  { %v385_v29 = vrot.slane %v384_v22, 1  ;;  %v391_v30 = vmax.f32 %v389_v13, %v390_v23  ;;  %v409_v31 = vrot.slane %v408_v28, 4  ;;  %v429_v32 = vsel %vm182_vm2, %v379_v25, -inf  ;;  %v2294_v13 = vld [vmem:[%s3213_s9 + $0x8] ss:$16 sps:$4 sm:$0xff]  }
 0x2a5   :  { %v424_v34 = vmax.f32 %v422_v24, %v423_v27  ;;  %v430_v35 = vrot.slane %v429_v32, 4  ;;  %v406_v36 = vrot.slane %v405_v26, 1  ;;  %v377_v39 = vmax.f32 %v361_v21, 0.0  ;;  %v2308_v16 = vld [vmem:[%s3213_s9 + $0x4c] ss:$16 sps:$4 sm:$0xff]  }
 0x2a6   :  { %v392_v37 = vrot.slane %v391_v30, 1  ;;  %v410_v38 = vmax.f32 %v408_v28, %v409_v31  ;;  %v386_v40 = vmax.f32 %v384_v22, %v385_v29  ;;  %v400_v46 = vmax.f32 %v398_v18, %v399_v33  ;;  %v2306_v17 = vld [vmem:[%s3213_s9 + $0x48] ss:$16 sps:$4 sm:$0xff]   ;;  %v2314_v18 = vld [vmem:[%s3213_s9 + $0x6c] ss:$16 sps:$4 sm:$0xff]  }
 0x2a7   :  { %v431_v41 = vmax.f32 %v429_v32, %v430_v35  ;;  %v425_v43 = vrot.slane %v424_v34, 2  ;;  %v415_v45 = vsel %vm182_vm2, %v377_v39, -inf  ;;  %v407_v49 = vmax.f32 %v405_v26, %v406_v36  ;;  %v2312_v19 = vld [vmem:[%s3213_s9 + $0x68] ss:$16 sps:$4 sm:$0xff]   ;;  %v2320_v20 = vld [vmem:[%s3213_s9 + $0x8c] ss:$16 sps:$4 sm:$0xff]  }
 0x2a8   :  { %v393_v42 = vmax.f32 %v391_v30, %v392_v37  ;;  %v411_v44 = vrot.slane %v410_v38, 2  ;;  %v416_v48 = vrot.slane %v415_v45, 4  ;;  %v2318_v21 = vld [vmem:[%s3213_s9 + $0x88] ss:$16 sps:$4 sm:$0xff]   ;;  %v2326_v22 = vld [vmem:[%s3213_s9 + $0xac] ss:$16 sps:$4 sm:$0xff]  }
 0x2a9   :  { %v432_v47 = vrot.slane %v431_v41, 2  ;;  %v426_v54 = vmax.f32 %v424_v34, %v425_v43  ;;  %v2324_v23 = vld [vmem:[%s3213_s9 + $0xa8] ss:$16 sps:$4 sm:$0xff]   ;;  %v2332_v24 = vld [vmem:[%s3213_s9 + $0xcc] ss:$16 sps:$4 sm:$0xff]  }
 0x2aa   :  { %v449_v50 = vsel %vm448_vm3, %v393_v42, %v386_v40  ;;  %v412_v51 = vmax.f32 %v410_v38, %v411_v44  ;;  %v417_v53 = vmax.f32 %v415_v45, %v416_v48  ;;  %v2330_v25 = vld [vmem:[%s3213_s9 + $0xc8] ss:$16 sps:$4 sm:$0xff]   ;;  %v2338_v26 = vld [vmem:[%s3213_s9 + $0xec] ss:$16 sps:$4 sm:$0xff]   ;;  %v2377_v40 = vld [vmem:[%s3213_s9 + $0x1c4] ss:$16 sps:$4 sm:$0xff]  }
 0x2ab   :  { %v451_v52 = vsel %vm450_vm4, %v400_v46, %v449_v50  ;;  %v433_v57 = vmax.f32 %v431_v41, %v432_v47  ;;  %v427_v61 = vrot.slane %v426_v54, 1  ;;  %v2336_v27 = vld [vmem:[%s3213_s9 + $0xe8] ss:$16 sps:$4 sm:$0xff]   ;;  %v2344_v28 = vld [vmem:[%s3213_s9 + $0x10c] ss:$16 sps:$4 sm:$0xff]   ;;  %1480 = vmatprep.subr.bf16.mxu0 %v2377_v40  ;;  %v509_v50 = vlaneseq }
 0x2ac   :  { %v413_v55 = vrot.slane %v412_v51, 1  ;;  %v453_v56 = vsel %vm452_vm5, %v407_v49, %v451_v52  ;;  %v418_v58 = vrot.slane %v417_v53, 2  ;;  %v2342_v29 = vld [vmem:[%s3213_s9 + $0x108] ss:$16 sps:$4 sm:$0xff]   ;;  %v2350_v30 = vld [vmem:[%s3213_s9 + $0x12c] ss:$16 sps:$4 sm:$0xff]  }
 0x2ad   :  { %v434_v63 = vrot.slane %v433_v57, 1  ;;  %v428_v2 = vmax.f32 %v426_v54, %v427_v61  ;;  %v2348_v31 = vld [vmem:[%s3213_s9 + $0x128] ss:$16 sps:$4 sm:$0xff]   ;;  %v2356_v32 = vld [vmem:[%s3213_s9 + $0x14c] ss:$16 sps:$4 sm:$0xff]  }
 0x2ae   :  { %v414_v59 = vmax.f32 %v412_v51, %v413_v55  ;;  %v419_v60 = vmax.f32 %v417_v53, %v418_v58  ;;  %v2354_v33 = vld [vmem:[%s3213_s9 + $0x148] ss:$16 sps:$4 sm:$0xff]   ;;  %v2362_v34 = vld [vmem:[%s3213_s9 + $0x16c] ss:$16 sps:$4 sm:$0xff]   ;;  %v2375_v42 = vld [vmem:[%s3213_s9 + $0x1c0] ss:$16 sps:$4 sm:$0xff]  }
 0x2af   :  { %v435_v3 = vmax.f32 %v433_v57, %v434_v63  ;;  %v2360_v35 = vld [vmem:[%s3213_s9 + $0x168] ss:$16 sps:$4 sm:$0xff]   ;;  %v2368_v36 = vld [vmem:[%s3213_s9 + $0x18c] ss:$16 sps:$4 sm:$0xff]   ;;  %1481 = vmatpush1.bf16.msra.mxu0 %v2375_v42  ;;  %v2383_v44 = vld [vmem:[%s3213_s9 + $0x1e4] ss:$16 sps:$4 sm:$0xff]  }
 0x2b0   :  { %v455_v62 = vsel %vm454_vm6, %v414_v59, %v453_v56  ;;  %v420_v0 = vrot.slane %v419_v60, 1  ;;  %v2366_v37 = vld [vmem:[%s3213_s9 + $0x188] ss:$16 sps:$4 sm:$0xff]   ;;  %v2374_v38 = vld [vmem:[%s3213_s9 + $0x1ac] ss:$16 sps:$4 sm:$0xff]   ;;  %1482 = vmatprep.subr.bf16.mxu0 %v2383_v44  ;;  %v2881_v51 = vshrl.u32 %v509_v50, 7 }
 0x2b1   :  { %v2372_v39 = vld [vmem:[%s3213_s9 + $0x1a8] ss:$16 sps:$4 sm:$0xff]   ;;  %v2380_v41 = vld [vmem:[%s3213_s9 + $0x1cc] ss:$16 sps:$4 sm:$0xff]   ;;  %v2381_v46 = vld [vmem:[%s3213_s9 + $0x1e0] ss:$16 sps:$4 sm:$0xff]  }
 0x2b2   :  { %v421_v1 = vmax.f32 %v419_v60, %v420_v0  ;;  %v2378_v43 = vld [vmem:[%s3213_s9 + $0x1c8] ss:$16 sps:$4 sm:$0xff]   ;;  %v2386_v45 = vld [vmem:[%s3213_s9 + $0x1ec] ss:$16 sps:$4 sm:$0xff]   ;;  %v2389_v48 = vld [vmem:[%s3213_s9 + $0x204] ss:$16 sps:$4 sm:$0xff]  }
 0x2b3   :  { %v2384_v47 = vld [vmem:[%s3213_s9 + $0x1e8] ss:$16 sps:$4 sm:$0xff]   ;;  %1483 = vmatpush1.bf16.msra.mxu0 %v2381_v46  ;;  %v2392_v49 = vld [vmem:[%s3213_s9 + $0x20c] ss:$16 sps:$4 sm:$0xff]   ;;  %v511_v52 = vsub.s32 0, %v2881_v51  ;;  %v515_v54 = vsub.s32 1, %v2881_v51 }
 0x2b4   :  { %v457_v4 = vsel %vm456_vm7, %v421_v1, %v455_v62  ;;  %1493 = vmatprep.subr.bf16.mxu0 %v2389_v48  ;;  %v2887_v53 = vld [vmem:[%s3216_s8] sm:$0xf]  ;;  %v523_v62 = vsub.s32 3, %v2881_v51  ;;  %v2437_v42 = vld [vmem:[%s3213_s9 + $0x304] ss:$16 sps:$4 sm:$0xff]  }
 0x2b5   :  { %v459_v5 = vsel %vm458_vm8, %v428_v2, %v457_v4  ;;  %v512_v55 = vrot.slane %v2887_v53, %v511_v52  ;;  %v516_v56 = vrot.slane %v2887_v53, %v515_v54  ;;  %v2390_v4 = vld [vmem:[%s3213_s9 + $0x208] ss:$16 sps:$4 sm:$0xff]   ;;  %v2429_v40 = vld [vmem:[%s3213_s9 + $0x2e0] ss:$16 sps:$4 sm:$0xff]   ;;  %v2443_v46 = vld [vmem:[%s3213_s9 + $0x324] ss:$16 sps:$4 sm:$0xff]  }
 0x2b6   :  { %v461_v6 = vsel %vm460_vm9, %v435_v3, %v459_v5  ;;  %v2387_v3 = vld [vmem:[%s3213_s9 + $0x200] ss:$16 sps:$4 sm:$0xff]   ;;  %v524_v5 = vrot.slane %v2887_v53, %v523_v62  ;;  %v2449_v50 = vld [vmem:[%s3213_s9 + $0x344] ss:$16 sps:$4 sm:$0xff]  }
 0x2b7   :  { %463 = vst.msk [vmem:[#allocation2] sm:$0xff] %vm182_vm2, %v461_v6  ;;  %v2435_v44 = vld [vmem:[%s3213_s9 + $0x300] ss:$16 sps:$4 sm:$0xff]  }
 0x2b8   :  { %v2441_v48 = vld [vmem:[%s3213_s9 + $0x320] ss:$16 sps:$4 sm:$0xff]  }
 0x2be   :  { %v497_v7 = vld [vmem:[#allocation2] sm:$0xff] }
 0x2bf   :  { %v498_v9 = vpack.c.bf16 %v497_v7, %v497_v7  ;;  %v2395_v7 = vld [vmem:[%s3213_s9 + $0x224] ss:$16 sps:$4 sm:$0xff]  }
 0x2c1   :  { %1999 = vmatmul.mubr.msk.bf16.vlgmr.msra.gmra.mrb[4].mxu1 %vm182_vm2, %v498_v9 }
 0x2c2   :  { %614 = vmatpush1.bf16.msra.mxu1 %v2285_v8  ;;  %645 = vmatprep.mubr.bf16.mxu1 %v2515_v14  ;;  %v2300_v14 = vld [vmem:[%s3213_s9 + $0x28] ss:$16 sps:$4 sm:$0xff]   ;;  %v2398_v8 = vld [vmem:[%s3213_s9 + $0x22c] ss:$16 sps:$4 sm:$0xff]  }
 0x2c3   :  { %615 = vmatprep.subr.bf16.mxu1 %v2290_v10 }
 0x2c6   :  { %616 = vmatpush1.bf16.msra.mxu1 %v2288_v11 }
 0x2c7   :  { %1534 = vmatprep.subr.bf16.mxu1 %v2296_v12 }
 0x2c9   :  { %2000 = vmatmul.mubr.msk.bf16.vlgmr.msra.gmra.mrb[8].mxu1 %vm182_vm2, %v498_v9 }
 0x2ca   :  { %1535 = vmatpush1.bf16.msra.mxu1 %v2294_v13  ;;  %v2393_v13 = vld [vmem:[%s3213_s9 + $0x220] ss:$16 sps:$4 sm:$0xff]  }
 0x2cb   :  { %1536 = vmatprep.subr.bf16.mxu1 %v2302_v15  ;;  %v2396_v15 = vld [vmem:[%s3213_s9 + $0x228] ss:$16 sps:$4 sm:$0xff]  }
 0x2ce   :  { %1537 = vmatpush1.bf16.msra.mxu1 %v2300_v14 }
 0x2cf   :  { %1538 = vmatprep.subr.bf16.mxu1 %v2308_v16  ;;  %v2401_v16 = vld [vmem:[%s3213_s9 + $0x244] ss:$16 sps:$4 sm:$0xff]  }
 0x2d2   :  { %1539 = vmatpush1.bf16.msra.mxu1 %v2306_v17  ;;  %v2404_v17 = vld [vmem:[%s3213_s9 + $0x24c] ss:$16 sps:$4 sm:$0xff]  }
 0x2d3   :  { %1540 = vmatprep.subr.bf16.mxu1 %v2314_v18 }
 0x2d6   :  { %1541 = vmatpush1.bf16.msra.mxu1 %v2312_v19 }
 0x2d7   :  { %1542 = vmatprep.subr.bf16.mxu1 %v2320_v20  ;;  %v2399_v20 = vld [vmem:[%s3213_s9 + $0x240] ss:$16 sps:$4 sm:$0xff]  }
 0x2da   :  { %1543 = vmatpush1.bf16.msra.mxu1 %v2318_v21  ;;  %v2402_v21 = vld [vmem:[%s3213_s9 + $0x248] ss:$16 sps:$4 sm:$0xff]  }
 0x2db   :  { %1544 = vmatprep.subr.bf16.mxu1 %v2326_v22  ;;  %v2407_v22 = vld [vmem:[%s3213_s9 + $0x264] ss:$16 sps:$4 sm:$0xff]  }
 0x2de   :  { %1545 = vmatpush1.bf16.msra.mxu1 %v2324_v23  ;;  %v2410_v23 = vld [vmem:[%s3213_s9 + $0x26c] ss:$16 sps:$4 sm:$0xff]  }
 0x2df   :  { %1546 = vmatprep.subr.bf16.mxu1 %v2332_v24  ;;  %v2405_v24 = vld [vmem:[%s3213_s9 + $0x260] ss:$16 sps:$4 sm:$0xff]  }
 0x2e2   :  { %1547 = vmatpush1.bf16.msra.mxu1 %v2330_v25  ;;  %v2408_v25 = vld [vmem:[%s3213_s9 + $0x268] ss:$16 sps:$4 sm:$0xff]  }
 0x2e3   :  { %1548 = vmatprep.subr.bf16.mxu1 %v2338_v26  ;;  %v2413_v26 = vld [vmem:[%s3213_s9 + $0x284] ss:$16 sps:$4 sm:$0xff]  }
 0x2e6   :  { %1549 = vmatpush1.bf16.msra.mxu1 %v2336_v27  ;;  %v2416_v27 = vld [vmem:[%s3213_s9 + $0x28c] ss:$16 sps:$4 sm:$0xff]  }
 0x2e7   :  { %1550 = vmatprep.subr.bf16.mxu1 %v2344_v28  ;;  %v2411_v28 = vld [vmem:[%s3213_s9 + $0x280] ss:$16 sps:$4 sm:$0xff]  }
 0x2ea   :  { %1551 = vmatpush1.bf16.msra.mxu1 %v2342_v29  ;;  %v2414_v29 = vld [vmem:[%s3213_s9 + $0x288] ss:$16 sps:$4 sm:$0xff]  }
 0x2eb   :  { %1552 = vmatprep.subr.bf16.mxu1 %v2350_v30  ;;  %v2419_v30 = vld [vmem:[%s3213_s9 + $0x2a4] ss:$16 sps:$4 sm:$0xff]  }
 0x2ee   :  { %1553 = vmatpush1.bf16.msra.mxu1 %v2348_v31  ;;  %v2422_v31 = vld [vmem:[%s3213_s9 + $0x2ac] ss:$16 sps:$4 sm:$0xff]  }
 0x2ef   :  { %1554 = vmatprep.subr.bf16.mxu1 %v2356_v32  ;;  %v2417_v32 = vld [vmem:[%s3213_s9 + $0x2a0] ss:$16 sps:$4 sm:$0xff]  }
 0x2f2   :  { %1555 = vmatpush1.bf16.msra.mxu1 %v2354_v33  ;;  %v2420_v33 = vld [vmem:[%s3213_s9 + $0x2a8] ss:$16 sps:$4 sm:$0xff]  }
 0x2f3   :  { %1556 = vmatprep.subr.bf16.mxu1 %v2362_v34  ;;  %v2425_v34 = vld [vmem:[%s3213_s9 + $0x2c4] ss:$16 sps:$4 sm:$0xff]  }
 0x2f6   :  { %1557 = vmatpush1.bf16.msra.mxu1 %v2360_v35  ;;  %v2428_v35 = vld [vmem:[%s3213_s9 + $0x2cc] ss:$16 sps:$4 sm:$0xff]  }
 0x2f7   :  { %1558 = vmatprep.subr.bf16.mxu1 %v2368_v36  ;;  %v2423_v36 = vld [vmem:[%s3213_s9 + $0x2c0] ss:$16 sps:$4 sm:$0xff]  }
 0x2fa   :  { %1559 = vmatpush1.bf16.msra.mxu1 %v2366_v37  ;;  %v2426_v37 = vld [vmem:[%s3213_s9 + $0x2c8] ss:$16 sps:$4 sm:$0xff]  }
 0x2fb   :  { %1560 = vmatprep.subr.bf16.mxu1 %v2374_v38  ;;  %v2431_v38 = vld [vmem:[%s3213_s9 + $0x2e4] ss:$16 sps:$4 sm:$0xff]  }
 0x2fe   :  { %1561 = vmatpush1.bf16.msra.mxu1 %v2372_v39  ;;  %v2434_v39 = vld [vmem:[%s3213_s9 + $0x2ec] ss:$16 sps:$4 sm:$0xff]  }
 0x2ff   :  { %1562 = vmatprep.subr.bf16.mxu1 %v2380_v41  ;;  %v2432_v41 = vld [vmem:[%s3213_s9 + $0x2e8] ss:$16 sps:$4 sm:$0xff]  }
 0x302   :  { %1563 = vmatpush1.bf16.msra.mxu1 %v2378_v43  ;;  %v2440_v43 = vld [vmem:[%s3213_s9 + $0x30c] ss:$16 sps:$4 sm:$0xff]  }
 0x303   :  { %1564 = vmatprep.subr.bf16.mxu1 %v2386_v45  ;;  %v2438_v45 = vld [vmem:[%s3213_s9 + $0x308] ss:$16 sps:$4 sm:$0xff]  }
 0x306   :  { %1565 = vmatpush1.bf16.msra.mxu1 %v2384_v47  ;;  %v2446_v47 = vld [vmem:[%s3213_s9 + $0x32c] ss:$16 sps:$4 sm:$0xff]  }
 0x307   :  { %1575 = vmatprep.subr.bf16.mxu1 %v2392_v49  ;;  %v2444_v49 = vld [vmem:[%s3213_s9 + $0x328] ss:$16 sps:$4 sm:$0xff]  }
 0x394   :  { %v606_v57 = vpop.f32.mrb[4].mxu1 }
 0x395   :  { %v607_v58 = vadd.f32 %v606_v57, %v512_v55  ;;  %v608_v59 = vpop.f32.mrb[5].mxu1  ;;  %v2452_v55 = vld [vmem:[%s3213_s9 + $0x34c] ss:$16 sps:$4 sm:$0xff]   ;;  %v2450_v57 = vld [vmem:[%s3213_s9 + $0x348] ss:$16 sps:$4 sm:$0xff]  }
 0x396   :  { %v609_v60 = vadd.f32 %v608_v59, %v516_v56  ;;  %v610_v61 = vpop.f32.mrb[6].mxu1  ;;  %v2447_v56 = vld [vmem:[%s3213_s9 + $0x340] ss:$16 sps:$4 sm:$0xff]   ;;  %v2458_v59 = vld [vmem:[%s3213_s9 + $0x36c] ss:$16 sps:$4 sm:$0xff]  }
 0x397   :  { %v654_v63 = vmax.f32 %v607_v58, 0.0  ;;  %v611_v0 = vpop.f32.mrb[7].mxu1  ;;  %v2455_v58 = vld [vmem:[%s3213_s9 + $0x364] ss:$16 sps:$4 sm:$0xff]   ;;  %v2456_v61 = vld [vmem:[%s3213_s9 + $0x368] ss:$16 sps:$4 sm:$0xff]  }
 0x398   :  { %v655_v1 = vmax.f32 %v609_v60, 0.0  ;;  %v2453_v60 = vld [vmem:[%s3213_s9 + $0x360] ss:$16 sps:$4 sm:$0xff]   ;;  %v2464_v0 = vld [vmem:[%s3213_s9 + $0x38c] ss:$16 sps:$4 sm:$0xff]  }
 0x399   :  { %v658_v6 = vpack.c.bf16 %v654_v63, %v654_v63  ;;  %v2461_v63 = vld [vmem:[%s3213_s9 + $0x384] ss:$16 sps:$4 sm:$0xff]  }
 0x39a   :  { %v659_v2 = vpack.c.bf16 %v655_v1, %v655_v1  ;;  %v2459_v1 = vld [vmem:[%s3213_s9 + $0x380] ss:$16 sps:$4 sm:$0xff]  }
 0x39c   :  { %v2912_v9 = vpop.f32.mrb[8].mxu1  ;;  %1484 = vmatprep.mubr.bf16.mxu0 %v659_v2  ;;  %1566 = vmatprep.mubr.bf16.mxu1 %v659_v2  ;;  %v2462_v2 = vld [vmem:[%s3213_s9 + $0x388] ss:$16 sps:$4 sm:$0xff]  }
 0x39d   :  { %v649_v10 = vpop.f32.mrb[9].mxu1  ;;  %1485 = vmatmul.mubr.bf16.vlgmr.msra.gmra.mrb[20].mxu0 %v658_v6  ;;  %1567 = vmatmul.mubr.bf16.vlgmr.msra.gmra.mrb[12].mxu1 %v658_v6  ;;  %v2465_v6 = vld [vmem:[%s3213_s9 + $0x3a0] ss:$16 sps:$4 sm:$0xff]  }
 0x39e   :  { %v650_v11 = vadd.f32 %v649_v10, %v524_v5  ;;  %1494 = vmatpush1.bf16.msra.mxu0 %v2387_v3  ;;  %1576 = vmatpush1.bf16.msra.mxu1 %v2390_v4  ;;  %v651_v12 = vpop.f32.mrb[10].mxu1  ;;  %v519_v3 = vsub.s32 2, %v2881_v51  ;;  %v2467_v4 = vld [vmem:[%s3213_s9 + $0x3a4] ss:$16 sps:$4 sm:$0xff]   ;;  %v2470_v5 = vld [vmem:[%s3213_s9 + $0x3ac] ss:$16 sps:$4 sm:$0xff]  }
 0x39f   :  { %v652_v14 = vpop.f32.mrb[11].mxu1  ;;  %1495 = vmatprep.subr.bf16.mxu0 %v2395_v7  ;;  %1577 = vmatprep.subr.bf16.mxu1 %v2398_v8  ;;  %v2468_v7 = vld [vmem:[%s3213_s9 + $0x3a8] ss:$16 sps:$4 sm:$0xff]   ;;  %v2473_v10 = vld [vmem:[%s3213_s9 + $0x3c4] ss:$16 sps:$4 sm:$0xff]  }
 0x3a0   :  { %v657_v18 = vmax.f32 %v650_v11, 0.0  ;;  %v520_v8 = vrot.slane %v2887_v53, %v519_v3  ;;  %v2476_v11 = vld [vmem:[%s3213_s9 + $0x3cc] ss:$16 sps:$4 sm:$0xff]   ;;  %v2471_v12 = vld [vmem:[%s3213_s9 + $0x3c0] ss:$16 sps:$4 sm:$0xff]  }
 0x3a1   :  { %v2474_v53 = vld [vmem:[%s3213_s9 + $0x3c8] ss:$16 sps:$4 sm:$0xff]   ;;  %v2482_v14 = vld [vmem:[%s3213_s9 + $0x3ec] ss:$16 sps:$4 sm:$0xff]  }
 0x3a2   :  { %v661_v19 = vpack.c.bf16 %v657_v18, %v657_v18  ;;  %1496 = vmatpush1.bf16.msra.mxu0 %v2393_v13  ;;  %1578 = vmatpush1.bf16.msra.mxu1 %v2396_v15  ;;  %v648_v13 = vadd.f32 %v2912_v9, %v520_v8  ;;  %v2479_v15 = vld [vmem:[%s3213_s9 + $0x3e4] ss:$16 sps:$4 sm:$0xff]   ;;  %v2480_v9 = vld [vmem:[%s3213_s9 + $0x3e8] ss:$16 sps:$4 sm:$0xff]  }
 0x3a3   :  { %1497 = vmatprep.subr.bf16.mxu0 %v2401_v16  ;;  %1579 = vmatprep.subr.bf16.mxu1 %v2404_v17  ;;  %v2477_v16 = vld [vmem:[%s3213_s9 + $0x3e0] ss:$16 sps:$4 sm:$0xff]  }
 0x3a4   :  { %1525 = vmatprep.mubr.bf16.mxu0 %v661_v19  ;;  %1607 = vmatprep.mubr.bf16.mxu1 %v661_v19  ;;  %v656_v17 = vmax.f32 %v648_v13, 0.0  ;;  %v2483_v18 = vld [vmem:[%s3215_s11 + $0x40] sm:$0xff]  }
 0x3a5   :  { %v2484_v19 = vld [vmem:[%s3215_s11 + $0xc0] sm:$0xff]  }
 0x3a6   :  { %1498 = vmatpush1.bf16.msra.mxu0 %v2399_v20  ;;  %1580 = vmatpush1.bf16.msra.mxu1 %v2402_v21  ;;  %v2485_v20 = vld [vmem:[%s3215_s11] sm:$0xff]  }
 0x3a7   :  { %1499 = vmatprep.subr.bf16.mxu0 %v2407_v22  ;;  %1581 = vmatprep.subr.bf16.mxu1 %v2410_v23  ;;  %v2486_v21 = vld [vmem:[%s3215_s11 + $0x80] sm:$0xff]   ;;  %v660_v22 = vpack.c.bf16 %v656_v17, %v656_v17  ;;  %v2487_v23 = vld [vmem:[%s3215_s11 + $0x48] sm:$0xff]  }
 0x3aa   :  { %1500 = vmatpush1.bf16.msra.mxu0 %v2405_v24  ;;  %1582 = vmatpush1.bf16.msra.mxu1 %v2408_v25  ;;  %v2488_v24 = vld [vmem:[%s3215_s11 + $0xc8] sm:$0xff]  }
 0x3ab   :  { %1501 = vmatprep.subr.bf16.mxu0 %v2413_v26  ;;  %1583 = vmatprep.subr.bf16.mxu1 %v2416_v27  ;;  %v2489_v25 = vld [vmem:[%s3215_s11 + $0x8] sm:$0xff]   ;;  %v2491_v27 = vld [vmem:[%s3215_s11 + $0x50] sm:$0xff]  }
 0x3ac   :  { %v2490_v26 = vld [vmem:[%s3215_s11 + $0x88] sm:$0xff]  }
 0x3ae   :  { %1502 = vmatpush1.bf16.msra.mxu0 %v2411_v28  ;;  %1584 = vmatpush1.bf16.msra.mxu1 %v2414_v29  ;;  %v2492_v28 = vld [vmem:[%s3215_s11 + $0xd0] sm:$0xff]  }
 0x3af   :  { %1503 = vmatprep.subr.bf16.mxu0 %v2419_v30  ;;  %1585 = vmatprep.subr.bf16.mxu1 %v2422_v31  ;;  %v2493_v29 = vld [vmem:[%s3215_s11 + $0x10] sm:$0xff]   ;;  %v2495_v31 = vld [vmem:[%s3215_s11 + $0x58] sm:$0xff]  }
 0x3b0   :  { %v2494_v30 = vld [vmem:[%s3215_s11 + $0x90] sm:$0xff]  }
 0x3b2   :  { %1504 = vmatpush1.bf16.msra.mxu0 %v2417_v32  ;;  %1586 = vmatpush1.bf16.msra.mxu1 %v2420_v33  ;;  %v2496_v32 = vld [vmem:[%s3215_s11 + $0xd8] sm:$0xff]  }
 0x3b3   :  { %1505 = vmatprep.subr.bf16.mxu0 %v2425_v34  ;;  %1587 = vmatprep.subr.bf16.mxu1 %v2428_v35  ;;  %v2497_v33 = vld [vmem:[%s3215_s11 + $0x18] sm:$0xff]   ;;  %v2499_v35 = vld [vmem:[%s3215_s11 + $0x60] sm:$0xff]  }
 0x3b4   :  { %v2498_v34 = vld [vmem:[%s3215_s11 + $0x98] sm:$0xff]  }
 0x3b6   :  { %1506 = vmatpush1.bf16.msra.mxu0 %v2423_v36  ;;  %1588 = vmatpush1.bf16.msra.mxu1 %v2426_v37  ;;  %v2500_v36 = vld [vmem:[%s3215_s11 + $0xe0] sm:$0xff]  }
 0x3b7   :  { %1507 = vmatprep.subr.bf16.mxu0 %v2431_v38  ;;  %1589 = vmatprep.subr.bf16.mxu1 %v2434_v39  ;;  %v2501_v37 = vld [vmem:[%s3215_s11 + $0x20] sm:$0xff]   ;;  %v2503_v39 = vld [vmem:[%s3215_s11 + $0x68] sm:$0xff]  }
 0x3b8   :  { %v2502_v38 = vld [vmem:[%s3215_s11 + $0xa0] sm:$0xff]  }
 0x3ba   :  { %1508 = vmatpush1.bf16.msra.mxu0 %v2429_v40  ;;  %1590 = vmatpush1.bf16.msra.mxu1 %v2432_v41  ;;  %v2504_v40 = vld [vmem:[%s3215_s11 + $0xe8] sm:$0xff]  }
 0x3bb   :  { %1509 = vmatprep.subr.bf16.mxu0 %v2437_v42  ;;  %1591 = vmatprep.subr.bf16.mxu1 %v2440_v43  ;;  %v2505_v41 = vld [vmem:[%s3215_s11 + $0x28] sm:$0xff]   ;;  %v2507_v43 = vld [vmem:[%s3215_s11 + $0x70] sm:$0xff]  }
 0x3bc   :  { %v2506_v42 = vld [vmem:[%s3215_s11 + $0xa8] sm:$0xff]  }
 0x3be   :  { %1510 = vmatpush1.bf16.msra.mxu0 %v2435_v44  ;;  %1592 = vmatpush1.bf16.msra.mxu1 %v2438_v45  ;;  %v2508_v44 = vld [vmem:[%s3215_s11 + $0xf0] sm:$0xff]  }
 0x3bf   :  { %1511 = vmatprep.subr.bf16.mxu0 %v2443_v46  ;;  %1593 = vmatprep.subr.bf16.mxu1 %v2446_v47  ;;  %v2509_v45 = vld [vmem:[%s3215_s11 + $0x30] sm:$0xff]   ;;  %v2511_v47 = vld [vmem:[%s3215_s11 + $0x78] sm:$0xff]  }
 0x3c0   :  { %v2510_v46 = vld [vmem:[%s3215_s11 + $0xb0] sm:$0xff]  }
 0x3c2   :  { %1512 = vmatpush1.bf16.msra.mxu0 %v2441_v48  ;;  %1594 = vmatpush1.bf16.msra.mxu1 %v2444_v49  ;;  %v2512_v48 = vld [vmem:[%s3215_s11 + $0xf8] sm:$0xff]  }
 0x3c3   :  { %1513 = vmatprep.subr.bf16.mxu0 %v2449_v50  ;;  %1595 = vmatprep.subr.bf16.mxu1 %v2452_v55  ;;  %v2513_v49 = vld [vmem:[%s3215_s11 + $0x38] sm:$0xff]   ;;  %v790_v55 = vld [vmem:[%s3217_s10] sm:$0xf] }
 0x3c4   :  { %v2514_v50 = vld [vmem:[%s3215_s11 + $0xb8] sm:$0xff]  }
 0x3c6   :  { %1514 = vmatpush1.bf16.msra.mxu0 %v2447_v56  ;;  %1596 = vmatpush1.bf16.msra.mxu1 %v2450_v57  ;;  %v795_v56 = vrot.slane %v790_v55, %v511_v52  ;;  %v803_v57 = vrot.slane %v790_v55, %v519_v3 }
 0x3c7   :  { %1515 = vmatprep.subr.bf16.mxu0 %v2455_v58  ;;  %1597 = vmatprep.subr.bf16.mxu1 %v2458_v59  ;;  %v799_v58 = vrot.slane %v790_v55, %v515_v54  ;;  %v807_v59 = vrot.slane %v790_v55, %v523_v62 }
 0x3ca   :  { %1516 = vmatpush1.bf16.msra.mxu0 %v2453_v60  ;;  %1598 = vmatpush1.bf16.msra.mxu1 %v2456_v61 }
 0x3cb   :  { %1517 = vmatprep.subr.bf16.mxu0 %v2461_v63  ;;  %1599 = vmatprep.subr.bf16.mxu1 %v2464_v0 }
 0x3ce   :  { %1518 = vmatpush1.bf16.msra.mxu0 %v2459_v1  ;;  %1600 = vmatpush1.bf16.msra.mxu1 %v2462_v2 }
 0x3cf   :  { %1519 = vmatprep.subr.bf16.mxu0 %v2467_v4  ;;  %1601 = vmatprep.subr.bf16.mxu1 %v2470_v5 }
 0x3d2   :  { %1520 = vmatpush1.bf16.msra.mxu0 %v2465_v6  ;;  %1602 = vmatpush1.bf16.msra.mxu1 %v2468_v7 }
 0x3d3   :  { %1521 = vmatprep.subr.bf16.mxu0 %v2473_v10  ;;  %1603 = vmatprep.subr.bf16.mxu1 %v2476_v11 }
 0x3d6   :  { %1522 = vmatpush1.bf16.msra.mxu0 %v2471_v12  ;;  %1604 = vmatpush1.bf16.msra.mxu1 %v2474_v53 }
 0x3d7   :  { %1523 = vmatprep.subr.bf16.mxu0 %v2479_v15  ;;  %1605 = vmatprep.subr.bf16.mxu1 %v2482_v14  ;;  %v2129_v14 = vld [vmem:[%s3218_s12] ss:$0 sm:$0xff] }
 0x3da   :  { %1524 = vmatpush1.bf16.msra.mxu0 %v2477_v16  ;;  %1606 = vmatpush1.bf16.msra.mxu1 %v2480_v9 }
 0x3db   :  { %2179 = vmatprep.subr.bf16.mxu0 %v2483_v18  ;;  %2201 = vmatprep.subr.bf16.mxu1 %v2484_v19 }
 0x3dd   :  { %1526 = vmatmul.mubr.bf16.vlgmr.msra.gmra.mrb[20].mxu0 %v660_v22  ;;  %1608 = vmatmul.mubr.bf16.vlgmr.msra.gmra.mrb[12].mxu1 %v660_v22 }
 0x3de   :  { %2180 = vmatpush3.bf16.msra.mxu0 %v2485_v20  ;;  %2202 = vmatpush3.bf16.msra.mxu1 %v2486_v21 }
 0x3df   :  { %2181 = vmatprep.subr.bf16.mxu0 %v2487_v23  ;;  %2203 = vmatprep.subr.bf16.mxu1 %v2488_v24 }
 0x3e2   :  { %2182 = vmatpush3.bf16.msra.mxu0 %v2489_v25  ;;  %2204 = vmatpush3.bf16.msra.mxu1 %v2490_v26 }
 0x3e3   :  { %2183 = vmatprep.subr.bf16.mxu0 %v2491_v27  ;;  %2205 = vmatprep.subr.bf16.mxu1 %v2492_v28 }
 0x3e6   :  { %2184 = vmatpush3.bf16.msra.mxu0 %v2493_v29  ;;  %2206 = vmatpush3.bf16.msra.mxu1 %v2494_v30 }
 0x3e7   :  { %2185 = vmatprep.subr.bf16.mxu0 %v2495_v31  ;;  %2207 = vmatprep.subr.bf16.mxu1 %v2496_v32 }
 0x3ea   :  { %2186 = vmatpush3.bf16.msra.mxu0 %v2497_v33  ;;  %2208 = vmatpush3.bf16.msra.mxu1 %v2498_v34 }
 0x3eb   :  { %2187 = vmatprep.subr.bf16.mxu0 %v2499_v35  ;;  %2209 = vmatprep.subr.bf16.mxu1 %v2500_v36 }
 0x3ee   :  { %2188 = vmatpush3.bf16.msra.mxu0 %v2501_v37  ;;  %2210 = vmatpush3.bf16.msra.mxu1 %v2502_v38 }
 0x3ef   :  { %2189 = vmatprep.subr.bf16.mxu0 %v2503_v39  ;;  %2211 = vmatprep.subr.bf16.mxu1 %v2504_v40 }
 0x3f2   :  { %2190 = vmatpush3.bf16.msra.mxu0 %v2505_v41  ;;  %2212 = vmatpush3.bf16.msra.mxu1 %v2506_v42 }
 0x3f3   :  { %2191 = vmatprep.subr.bf16.mxu0 %v2507_v43  ;;  %2213 = vmatprep.subr.bf16.mxu1 %v2508_v44 }
 0x3f6   :  { %2192 = vmatpush3.bf16.msra.mxu0 %v2509_v45  ;;  %2214 = vmatpush3.bf16.msra.mxu1 %v2510_v46 }
 0x3f7   :  { %2193 = vmatprep.subr.bf16.mxu0 %v2511_v47  ;;  %2215 = vmatprep.subr.bf16.mxu1 %v2512_v48 }
 0x3fa   :  { %2194 = vmatpush3.bf16.msra.mxu0 %v2513_v49  ;;  %2216 = vmatpush3.bf16.msra.mxu1 %v2514_v50 }
 0x4b0   :  { %v1527_v60 = vpop.f32.mrb[20].mxu0  ;;  %v1609_v61 = vpop.f32.mrb[12].mxu1 }
 0x4b1   :  { %v2261_v63 = vadd.f32 %v1527_v60, %v795_v56  ;;  %v2263_v0 = vadd.f32 %v1609_v61, %v803_v57  ;;  %v1529_v1 = vpop.f32.mrb[21].mxu0  ;;  %v1611_v2 = vpop.f32.mrb[13].mxu1 }
 0x4b2   :  { %v2262_v4 = vadd.f32 %v1529_v1, %v799_v58  ;;  %v2264_v5 = vadd.f32 %v1611_v2, %v807_v59  ;;  %v1531_v6 = vpop.f32.mrb[22].mxu0  ;;  %v1613_v7 = vpop.f32.mrb[14].mxu1 }
 0x4b3   :  { %v1616_v52 = vmax.f32 %v2261_v63, 0.0  ;;  %v1618_v8 = vmax.f32 %v2263_v0, 0.0  ;;  %v1532_v10 = vpop.f32.mrb[23].mxu0  ;;  %v1614_v3 = vpop.f32.mrb[15].mxu1 }
 0x4b4   :  { %v1617_v11 = vmax.f32 %v2262_v4, 0.0  ;;  %v1619_v12 = vmax.f32 %v2264_v5, 0.0 }
 0x4b5   :  { %v1620_v51 = vpack.c.bf16 %v1616_v52, %v1616_v52  ;;  %v1622_v62 = vpack.c.bf16 %v1618_v8, %v1618_v8 }
 0x4b6   :  { %v1621_v54 = vpack.c.bf16 %v1617_v11, %v1617_v11  ;;  %v1623_v53 = vpack.c.bf16 %v1619_v12, %v1619_v12 }
 0x4b8   :  { %1919 = vmatprep.mubr.bf16.mxu0 %v1621_v54  ;;  %1959 = vmatprep.mubr.bf16.mxu1 %v1623_v53 }
 0x4b9   :  { %1920 = vmatmul.mubr.bf16.vlgmr.msra.gmra.mrb[24].mxu0 %v1620_v51  ;;  %1960 = vmatmul.mubr.bf16.vlgmr.msra.gmra.mrb[16].mxu1 %v1622_v62 }
 0x58c   :  { %v2195_v13 = vpop.f32.mrb[24].mxu0  ;;  %v2217_v15 = vpop.f32.mrb[16].mxu1 }
 0x58d   :  { %v2196_v16 = vpop.f32.mrb[25].mxu0  ;;  %v2218_v9 = vpop.f32.mrb[17].mxu1 }
 0x58e   :  { %v2197_v17 = vadd.f32 %v2196_v16, %v2195_v13  ;;  %v2219_v18 = vadd.f32 %v2218_v9, %v2217_v15  ;;  %v2198_v19 = vpop.f32.mrb[26].mxu0  ;;  %v2220_v20 = vpop.f32.mrb[18].mxu1 }
 0x58f   :  { %v2199_v21 = vpop.f32.mrb[27].mxu0  ;;  %v2221_v22 = vpop.f32.mrb[19].mxu1 }
 0x590   :  { %v1922_v23 = vadd.f32 %v2197_v17, %v2129_v14 }
 0x592   :  { %v1962_v24 = vadd.f32 %v2219_v18, %v1922_v23 }
 0x594   :  { %1967 = vst [vmem:[%s3219_s13] sm:$0xff] %v1962_v24 }

</bundles_post_ra>
